<compile_context>
chip_gen: v7x
topology: tpu7x:2x2x1
jax: 0.10.0
libtpu: 0.0.40
codegen_flags: <defaults>
</compile_context>

<pallas_src>
import functools

import jax
import jax.numpy as jnp
from jax.experimental import pallas as pl
from jax.experimental.pallas import tpu as pltpu


def _kernel_body(scale_ref, pred_ref, tgt_ref, w_ref, out_ref, acc_ref):
    """One S-tile of the weighted L1 reduction.

    scale_ref: SMEM (1,)            f32
    pred_ref : VMEM (TS, 1, PC)     native dtype
    tgt_ref  : VMEM (TS, O, PC)     native dtype
    w_ref    : VMEM (TS, O, PC) or None
    out_ref  : VMEM (O, 1)          f32  (resident across the grid)
    acc_ref  : VMEM (O, PC)         f32 scratch accumulator
    """
    s = pl.program_id(0)

    @pl.when(s == 0)
    def _():
        acc_ref[...] = jnp.zeros_like(acc_ref)

    pred = pred_ref[...].astype(jnp.float32)          # (TS, 1, PC)
    tgt = tgt_ref[...].astype(jnp.float32)            # (TS, O, PC)
    loss = jnp.abs(pred - tgt)                        # broadcast over order axis
    if w_ref is not None:
        loss = loss * w_ref[...].astype(jnp.float32)

    # Reduce over the leading (batch) S-tile axis: pure VPU elementwise adds
    # into the lane-dense resident accumulator; no XLU work per step.
    acc_ref[...] += jnp.sum(loss, axis=0)             # (O, PC)

    @pl.when(s == pl.num_programs(0) - 1)
    def _():
        out_ref[...] = (
            jnp.sum(acc_ref[...], axis=-1, keepdims=True) * scale_ref[0]
        ).astype(out_ref.dtype)


def _kernel_weighted(scale_ref, pred_ref, tgt_ref, w_ref, out_ref, acc_ref):
    _kernel_body(scale_ref, pred_ref, tgt_ref, w_ref, out_ref, acc_ref)


def _kernel_unweighted(scale_ref, pred_ref, tgt_ref, out_ref, acc_ref):
    _kernel_body(scale_ref, pred_ref, tgt_ref, None, out_ref, acc_ref)


def _pick_tile_s(S, O, PC, itemsize, weighted, budget_bytes=16 * 1024 * 1024):
    """Largest divisor of S whose double-buffered input tiles fit the budget."""
    rows = 1 + O * (2 if weighted else 1)          # pred row + tgt (+ weight) rows
    per_s = rows * PC * itemsize * 2               # x2 for double buffering
    cap = max(1, budget_bytes // max(per_s, 1))
    ts = int(min(S, cap))
    while S % ts:                                  # avoid partial blocks
        ts -= 1
    return ts


def ordered_pts_l1_loss(pred, target, weight=None, *, avg_factor, loss_weight=1.0,
                        tile_s=None):
    """Pallas implementation of OrderedPtsL1Loss.forward with reduction='mean'."""
    if avg_factor is None:
        raise ValueError("avg_factor should not be none for OrderedPtsL1Loss")

    S, P, C = pred.shape
    S2, O, P2, C2 = target.shape
    assert (S, P, C) == (S2, P2, C2)
    weighted = weight is not None
    if weighted:
        assert weight.shape == target.shape

    PC = P * C
    # Free, contiguous reshapes only -- no transpose, no dtype cast in HBM.
    pred_r = pred.reshape(S, 1, PC)
    tgt_r = target.reshape(S, O, PC)
    args = [pred_r, tgt_r]
    if weighted:
        args.append(weight.reshape(S, O, PC))

    # scale as an SMEM scalar so traced avg_factor / loss_weight work.
    scale = (jnp.asarray(loss_weight, jnp.float32)
             / jnp.asarray(avg_factor, jnp.float32)).reshape(1)

    if tile_s is None:
        tile_s = _pick_tile_s(S, O, PC, jnp.dtype(target.dtype).itemsize, weighted)
    else:
        tile_s = int(min(tile_s, S))
        while S % tile_s:
            tile_s -= 1
    grid = (S // tile_s,)

    in_specs = [
        pl.BlockSpec(memory_space=pltpu.MemorySpace.SMEM),           # scale
        pl.BlockSpec((tile_s, 1, PC), lambda s: (s, 0, 0)),          # pred
        pl.BlockSpec((tile_s, O, PC), lambda s: (s, 0, 0)),          # target
    ]
    if weighted:
        in_specs.append(pl.BlockSpec((tile_s, O, PC), lambda s: (s, 0, 0)))

    kernel = _kernel_weighted if weighted else _kernel_unweighted

    out = pl.pallas_call(
        kernel,
        out_shape=jax.ShapeDtypeStruct((O, 1), jnp.float32),
        grid=grid,
        in_specs=in_specs,
        out_specs=pl.BlockSpec((O, 1), lambda s: (0, 0)),            # resident
        scratch_shapes=[pltpu.VMEM((O, PC), jnp.float32)],
        compiler_params=pltpu.CompilerParams(
            dimension_semantics=("arbitrary",),
            vmem_limit_bytes=48 * 1024 * 1024,
        ),
    )(scale, *args)
    return out[:, 0]                                                  # [num_order]


def _reference(pred, target, weight, avg_factor, loss_weight):
    pred_e = jnp.broadcast_to(pred[:, None, :, :], target.shape).astype(jnp.float32)
    loss = jnp.abs(pred_e - target.astype(jnp.float32))
    if weight is not None:
        loss = loss * weight.astype(jnp.float32)
    loss = jnp.transpose(loss, (1, 0, 2, 3))
    return loss_weight * loss.sum(axis=(1, 2, 3)) / avg_factor


if __name__ == "__main__":
    key = jax.random.PRNGKey(0)
    k1, k2, k3 = jax.random.split(key, 3)

    # Small shapes consistent with the module's forward.
    num_samples, num_order, num_pts, num_coords = 6, 4, 8, 2
    pred = jax.random.normal(k1, (num_samples, num_pts, num_coords), jnp.float32)
    target = jax.random.normal(
        k2, (num_samples, num_order, num_pts, num_coords), jnp.float32
    )
    weight = jax.random.uniform(
        k3, (num_samples, num_order, num_pts, num_coords), jnp.float32
    )
    avg_factor = 4.0

    # Weighted path; tile_s=2 forces a multi-step grid to exercise accumulation.
    out_w = ordered_pts_l1_loss(
        pred, target, weight, avg_factor=avg_factor, loss_weight=2.0, tile_s=2
    )
    # Unweighted path (no ones materialization).
    out_nw = ordered_pts_l1_loss(
        pred, target, None, avg_factor=avg_factor, loss_weight=1.0
    )
    out_w, out_nw = jax.block_until_ready((out_w, out_nw))

    ref_w = _reference(pred, target, weight, avg_factor, 2.0)
    ref_nw = _reference(pred, target, None, avg_factor, 1.0)

    assert out_w.shape == (num_order,)
    assert out_nw.shape == (num_order,)
    assert jnp.allclose(out_w, ref_w, rtol=1e-5, atol=1e-5), (out_w, ref_w)
    assert jnp.allclose(out_nw, ref_nw, rtol=1e-5, atol=1e-5), (out_nw, ref_nw)

    print("KERNEL_OK")
</pallas_src>

<mosaic_0001>
module attributes {stable_mosaic.version = 11 : i64} {
  func.func @_kernel_weighted(%arg0: i32, %arg1: memref<1xf32, #tpu.memory_space<smem>>, %arg2: memref<2x1x16xf32, #tpu.memory_space<vmem>>, %arg3: memref<2x4x16xf32, #tpu.memory_space<vmem>>, %arg4: memref<2x4x16xf32, #tpu.memory_space<vmem>>, %arg5: memref<4x1xf32, #tpu.memory_space<vmem>>, %arg6: memref<4x16xf32, #tpu.memory_space<vmem>>) attributes {dimension_semantics = [#tpu.dimension_semantics<arbitrary>], iteration_bounds = array<i64: 3>, scalar_prefetch = 0 : i64, scratch_operands = 1 : i64, tpu.core_type = #tpu.core_type<tc>, window_params = [{transform_indices = @transform_0, window_bounds = array<i64: 1>}, {transform_indices = @transform_1, window_bounds = array<i64: 2, 1, 16>}, {transform_indices = @transform_2, window_bounds = array<i64: 2, 4, 16>}, {transform_indices = @transform_3, window_bounds = array<i64: 2, 4, 16>}, {pipeline_mode = #tpu.pipeline_mode<synchronous>, transform_indices = @transform_4, window_bounds = array<i64: 4, 1>}]} {
    %c0_i32 = arith.constant 0 : i32
    %0 = arith.cmpi eq, %arg0, %c0_i32 : i32
    %1 = arith.extui %0 : i1 to i32
    %c0_i32_0 = arith.constant 0 : i32
    %2 = arith.cmpi ne, %1, %c0_i32_0 : i32
    scf.if %2 {
      %cst_14 = arith.constant 0.000000e+00 : f32
      %17 = vector.broadcast %cst_14 : f32 to vector<4x16xf32>
      %c0_15 = arith.constant 0 : index
      %c0_16 = arith.constant 0 : index
      %18 = vector.load %arg6[%c0_15, %c0_16] : memref<4x16xf32, #tpu.memory_space<vmem>>, vector<4x16xf32>
      tpu.vector_store %arg6[%c0_15, %c0_16], %17 {strides = array<i32>} : memref<4x16xf32, #tpu.memory_space<vmem>>, vector<4x16xf32>,
    } else {
    }
    %c0 = arith.constant 0 : index
    %c0_1 = arith.constant 0 : index
    %c0_2 = arith.constant 0 : index
    %3 = vector.load %arg2[%c0, %c0_1, %c0_2] : memref<2x1x16xf32, #tpu.memory_space<vmem>>, vector<2x1x16xf32>
    %c0_3 = arith.constant 0 : index
    %c0_4 = arith.constant 0 : index
    %c0_5 = arith.constant 0 : index
    %4 = vector.load %arg3[%c0_3, %c0_4, %c0_5] : memref<2x4x16xf32, #tpu.memory_space<vmem>>, vector<2x4x16xf32>
    %5 = vector.broadcast %3 : vector<2x1x16xf32> to vector<2x4x16xf32>
    %6 = arith.subf %5, %4 : vector<2x4x16xf32>
    %7 = math.absf %6 : vector<2x4x16xf32>
    %c0_6 = arith.constant 0 : index
    %c0_7 = arith.constant 0 : index
    %c0_8 = arith.constant 0 : index
    %8 = vector.load %arg4[%c0_6, %c0_7, %c0_8] : memref<2x4x16xf32, #tpu.memory_space<vmem>>, vector<2x4x16xf32>
    %9 = arith.mulf %7, %8 : vector<2x4x16xf32>
    %c0_9 = arith.constant 0 : index
    %c0_10 = arith.constant 0 : index
    %10 = vector.load %arg6[%c0_9, %c0_10] : memref<4x16xf32, #tpu.memory_space<vmem>>, vector<4x16xf32>
    %cst = arith.constant dense<0.000000e+00> : vector<4x16xf32>
    %11 = vector.multi_reduction <add>, %9, %cst [0] : vector<2x4x16xf32> to vector<4x16xf32>
    %12 = arith.addf %10, %11 : vector<4x16xf32>
    %c0_11 = arith.constant 0 : index
    %c0_12 = arith.constant 0 : index
    %13 = vector.load %arg6[%c0_11, %c0_12] : memref<4x16xf32, #tpu.memory_space<vmem>>, vector<4x16xf32>
    tpu.vector_store %arg6[%c0_11, %c0_12], %12 {strides = array<i32>} : memref<4x16xf32, #tpu.memory_space<vmem>>, vector<4x16xf32>,
    %c2_i32 = arith.constant 2 : i32
    %14 = arith.cmpi eq, %arg0, %c2_i32 : i32
    %15 = arith.extui %14 : i1 to i32
    %c0_i32_13 = arith.constant 0 : i32
    %16 = arith.cmpi ne, %15, %c0_i32_13 : i32
    scf.if %16 {
      %c0_14 = arith.constant 0 : index
      %c0_15 = arith.constant 0 : index
      %17 = vector.load %arg6[%c0_14, %c0_15] : memref<4x16xf32, #tpu.memory_space<vmem>>, vector<4x16xf32>
      %cst_16 = arith.constant dense<0.000000e+00> : vector<4xf32>
      %18 = vector.multi_reduction <add>, %17, %cst_16 [1] : vector<4x16xf32> to vector<4xf32>
      %19 = vector.shape_cast %18 : vector<4xf32> to vector<4x1xf32>
      %c0_17 = arith.constant 0 : index
      %20 = memref.load %arg1[%c0_17] : memref<1xf32, #tpu.memory_space<smem>>
      %21 = vector.broadcast %20 : f32 to vector<4x1xf32>
      %22 = arith.mulf %19, %21 : vector<4x1xf32>
      %c0_18 = arith.constant 0 : index
      %c0_19 = arith.constant 0 : index
      %23 = vector.load %arg5[%c0_18, %c0_19] : memref<4x1xf32, #tpu.memory_space<vmem>>, vector<4x1xf32>
      tpu.vector_store %arg5[%c0_18, %c0_19], %22 {strides = array<i32>} : memref<4x1xf32, #tpu.memory_space<vmem>>, vector<4x1xf32>,
    } else {
    }
    return
  }
  func.func @transform_0(%arg0: i32) -> i32 {
    %c0_i32 = arith.constant 0 : i32
    %c0_i32_0 = arith.constant 0 : i32
    return %c0_i32 : i32
  }
  func.func @transform_1(%arg0: i32) -> (i32, i32, i32) {
    %c0_i32 = arith.constant 0 : i32
    %c0_i32_0 = arith.constant 0 : i32
    %c0_i32_1 = arith.constant 0 : i32
    return %arg0, %c0_i32, %c0_i32_0 : i32, i32, i32
  }
  func.func @transform_2(%arg0: i32) -> (i32, i32, i32) {
    %c0_i32 = arith.constant 0 : i32
    %c0_i32_0 = arith.constant 0 : i32
    %c0_i32_1 = arith.constant 0 : i32
    return %arg0, %c0_i32, %c0_i32_0 : i32, i32, i32
  }
  func.func @transform_3(%arg0: i32) -> (i32, i32, i32) {
    %c0_i32 = arith.constant 0 : i32
    %c0_i32_0 = arith.constant 0 : i32
    %c0_i32_1 = arith.constant 0 : i32
    return %arg0, %c0_i32, %c0_i32_0 : i32, i32, i32
  }
  func.func @transform_4(%arg0: i32) -> (i32, i32) {
    %c0_i32 = arith.constant 0 : i32
    %c0_i32_0 = arith.constant 0 : i32
    %c0_i32_1 = arith.constant 0 : i32
    return %c0_i32, %c0_i32_0 : i32, i32
  }
}

</mosaic_0001>

<bundles_post_ra>
// kernel: tpu_custom_call.1
= control target key start
LH: loop header
LB: loop body
LE: loop exit
PB: predicated region body
PF: predicated region fallthrough
CT: control target
= control target key end

     0   :  { %s860_s0 = inlined_call_operand.<no memory space> [shape: f32[1], index: 0, kind: input, shape index: {}]   ;;  %s861_s1 = inlined_call_operand.hbm [shape: f32[6,1,16], index: 1, kind: input, shape index: {}]   ;;  %s862_s2 = inlined_call_operand.hbm [shape: f32[6,4,16], index: 2, kind: input, shape index: {}]   ;;  %s863_s3 = inlined_call_operand.hbm [shape: f32[6,4,16], index: 3, kind: input, shape index: {}]   ;;  %s864_s4 = inlined_call_operand.vmem [shape: f32[4,1], index: 4, kind: output, shape index: {}]  }
   0x1   :  { %9 = sst [smem:[#allocation3]] %s860_s0 }
   0x2   :  { %10 = vsyncpa [#allocation5], 0 }
   0x3   :  { %12 = vsyncpa [#allocation5 + $0x1], 0 }
   0x4   :  { %13 = vsyncpa [#allocation7], 0 }
   0x5   :  { %15 = vsyncpa [#allocation7 + $0x1], 0  ;;  %s661_s17 = smov 0   ;;  %s663_s18 = smov 0  }
   0x6   :  { %s665_s19 = smov 0   ;;  %s667_s20 = smov 0  }
   0x7 LB: > { %s680_s0 = sadd.s32 4294967295, %s623_s20   ;;  %s683_s21 = sadd.s32 1, %s623_s20   ;;  %s623_s20 = sphi %s667_s20, %s875_s20   ;;  %s619_s19 = sphi %s665_s19, %s874_s19   ;;  %s615_s18 = sphi %s663_s18, %s873_s18   ;;  %s611_s17 = sphi %s661_s17, %s872_s17  }
   0x8   : > { %s46_s22 = ssub.s32 %s623_s20, %s683_s21  ;;  %s49_s23 = sadd.s32 1, %s619_s19 }
   0x9   : > { %p47_p0 = scmp.eq.s32.totalorder %s46_s22, 0  ;;  %p56_p1 = scmp.ne.s32.totalorder %s619_s19, %s615_s18 }
   0xa   : > { %p57_p2 = scmp.eq.s32.totalorder %s623_s20, 0  ;;  %p62_p3 = scmp.ne.s32.totalorder %s615_s18, %s611_s17 }
   0xb   : > { %s693_s24 = scalar_select %p47_p0, %s619_s19, %s49_s23  }
   0xc   : > { %p58_p4 = por %p57_p2, %p56_p1  ;;  %p63_p5 = scmp.eq.s32.totalorder %s680_s0, 0 }
   0xd   : > { %p457_p6 = scmp.lt.s32.totalorder %s623_s20, 3  ;;  %s702_s26 = sand.u32 1, %s619_s19  }
   0xe   : > { %p697_p7 = por %p63_p5, %p62_p3  ;;  %s183_s28 = sand.u32 1, %s623_s20  }
   0xf   : > { %p704_p8 = pnand %p457_p6, %p58_p4  ;;  %s422_s29 = sshll.u32 %s702_s26, 3 }
  0x10   : > { %s866_s25 = scalar_select %p697_p7, 1, 0 }
  0x11   : > { %s439_s30 = sshll.u32 %s623_s20, 7  ;;  %s187_s5 = scalar_lea.vmem [#allocation6], %s422_s29 }
  0x12   : > { %s194_s6 = sshll.u32 %s187_s5, 4  ;;  %s718_s9 = scalar_lea.hbm %s862_s2, %s439_s30  ;;  %s720_s6 = int_to_ptr.vmem [resolvable:$true] %s194_s6 }
  0x13   : > { %s722_s10 = scalar_lea.sflag [#allocation7], %s183_s28  ;;  %s495_s11 = scalar_lea.hbm %s718_s9, 128 }
  0x14   : > { %p496_p9 = scmp.ne.s32.totalorder %s718_s9, %s495_s11  ;;  %p728_p10 = pneg %p704_p8 }
  0x15   : > { %s500_s15 = scalar_lea.hbm %s862_s2, 384  ;;  %p501_p13 = scmp.lt.u32.totalorder %s718_s9, %s862_s2 }
  0x16   : > { %p498_p11 = pnand %p728_p10, %p496_p9  ;;  %p502_p0 = scmp.lt.u32.totalorder %s500_s15, %s495_s11 }
  0x17   : > { %p504_p2 = scmp.lt.u32.totalorder %s495_s11, %s718_s9 }
  0x18   : > { %p499_p12 = pneg %p498_p11  ;;  %p503_p1 = por %p502_p0, %p501_p13 }
  0x1a   : > { %p505_p3 = por %p504_p2, %p503_p1 }
  0x1c   : > { %p506_p4 = pnand %p505_p3, %p499_p12 }
  0x1e   : > { %509 = shalt.err (!%p506_p4)
}
  0x1f   : > { %s510_s22 = scalar_lea.vmem %s720_s6, 128  ;;  %s625_s23 = smov [#allocation6]  }
  0x20   : > { %p511_p5 = scmp.ne.s32.totalorder %s720_s6, %s510_s22  ;;  %s515_s28 = sshll.u32 %s625_s23, 4  ;;  %s516_s28 = int_to_ptr.vmem [resolvable:$false] %s515_s28 }
  0x21   : > { %s517_s5 = scalar_lea.vmem %s516_s28, 256  ;;  %p518_p11 = scmp.lt.s32.totalorder %s720_s6, %s516_s28 }
  0x22   : > { %p513_p6 = pnand %p511_p5, %p728_p10  ;;  %p519_p7 = scmp.lt.s32.totalorder %s517_s5, %s510_s22 }
  0x24   : > { %p514_p9 = pneg %p513_p6  ;;  %p520_p13 = por %p519_p7, %p518_p11 }
  0x26   : > { %p521_p0 = pnand %p520_p13, %p514_p9 }
  0x28   : > { %524 = shalt.err (!%p521_p0)
}
  0x29   : > { %s626_s7 = smov 64   ;;  %s627_s8 = smov 4  }
  0x2a   : > { %453 = dma.hbm_to_vmem [thread:$0]  (!%p704_p8), %s718_s9, 128, %s720_s6, %s722_s10, %s626_s7, %s626_s7, %s627_s8  }
  0x2b   : > { %s760_s14 = scalar_lea.hbm %s863_s3, %s439_s30  ;;  %s208_s15 = scalar_lea.vmem [#allocation8], %s422_s29 }
  0x2c   : > { %s215_s16 = sshll.u32 %s208_s15, 4  ;;  %p428_p7 = scmp.ge.s32.totalorder %s623_s20, 1  ;;  %s765_s16 = int_to_ptr.vmem [resolvable:$true] %s215_s16 }
  0x2d   : > { %p223_p12 = scmp.lt.s32.totalorder %s623_s20, 4  ;;  %s419_s17 = sshll.u32 %s702_s26, 1 }
  0x2e   : > { %s438_s6 = sshll.u32 %s623_s20, 5  ;;  %s166_s9 = scalar_lea.vmem [#allocation4], %s419_s17 }
  0x2f   : > { %p769_p1 = pnand %p428_p7, %p223_p12  ;;  %s173_s23 = sshll.u32 %s166_s9, 4  ;;  %s779_s23 = int_to_ptr.vmem [resolvable:$true] %s173_s23 }
  0x30   : > { %s777_s30 = scalar_lea.hbm %s861_s1, %s438_s6  ;;  %s163_s29 = scalar_lea.sflag [#allocation5], %s702_s26 }
  0x31   : > { %s869_s22 = scalar_select %p769_p1, 1, 0 }
  0x32   : > { %s525_s11 = scalar_lea.hbm %s777_s30, 32  ;;  %s530_s15 = scalar_lea.hbm %s861_s1, 96 }
  0x33   : > { %p526_p2 = scmp.ne.s32.totalorder %s777_s30, %s525_s11  ;;  %p531_p5 = scmp.lt.u32.totalorder %s777_s30, %s861_s1 }
  0x34   : > { %p532_p6 = scmp.lt.u32.totalorder %s530_s15, %s525_s11  ;;  %p534_p11 = scmp.lt.u32.totalorder %s525_s11, %s777_s30 }
  0x35   : > { %p528_p3 = pnand %p526_p2, %p728_p10 }
  0x36   : > { %p533_p9 = por %p532_p6, %p531_p5 }
  0x37   : > { %p529_p4 = pneg %p528_p3 }
  0x38   : > { %p535_p13 = por %p534_p11, %p533_p9 }
  0x3a   : > { %p536_p0 = pnand %p535_p13, %p529_p4 }
  0x3c   : > { %539 = shalt.err (!%p536_p0)
}
  0x3d   : > { %s540_s6 = scalar_lea.vmem %s779_s23, 32  ;;  %s628_s28 = smov [#allocation4]  }
  0x3e   : > { %p541_p7 = scmp.ne.s32.totalorder %s779_s23, %s540_s6  ;;  %s545_s5 = sshll.u32 %s628_s28, 4  ;;  %s546_s5 = int_to_ptr.vmem [resolvable:$false] %s545_s5 }
  0x3f   : > { %s547_s20 = scalar_lea.vmem %s546_s5, 64  ;;  %p548_p3 = scmp.lt.s32.totalorder %s779_s23, %s546_s5 }
  0x40   : > { %p543_p12 = pnand %p541_p7, %p728_p10  ;;  %p549_p1 = scmp.lt.s32.totalorder %s547_s20, %s540_s6 }
  0x42   : > { %p544_p2 = pneg %p543_p12  ;;  %p550_p5 = por %p549_p1, %p548_p3 }
  0x44   : > { %p551_p6 = pnand %p550_p5, %p544_p2 }
  0x46   : > { %554 = shalt.err (!%p551_p6)
}
  0x47   : > { %s629_s11 = smov 16   ;;  %s630_s13 = smov 1  }
  0x48   : > { %450 = dma.hbm_to_vmem [thread:$0]  (!%p704_p8), %s777_s30, 32, %s779_s23, %s163_s29, %s629_s11, %s629_s11, %s630_s13  }
  0x49   : > { %s555_s15 = scalar_lea.hbm %s760_s14, 128  ;;  %s560_s6 = scalar_lea.hbm %s863_s3, 384 }
  0x4a   : > { %p556_p4 = scmp.ne.s32.totalorder %s760_s14, %s555_s15  ;;  %p561_p11 = scmp.lt.u32.totalorder %s760_s14, %s863_s3 }
  0x4b   : > { %p562_p13 = scmp.lt.u32.totalorder %s560_s6, %s555_s15  ;;  %p564_p7 = scmp.lt.u32.totalorder %s555_s15, %s760_s14 }
  0x4c   : > { %p558_p1 = pnand %p556_p4, %p728_p10 }
  0x4d   : > { %p563_p0 = por %p562_p13, %p561_p11 }
  0x4e   : > { %p559_p9 = pneg %p558_p1 }
  0x4f   : > { %p565_p12 = por %p564_p7, %p563_p0 }
  0x51   : > { %p566_p2 = pnand %p565_p12, %p559_p9 }
  0x53   : > { %569 = shalt.err (!%p566_p2)
}
  0x54   : > { %s570_s26 = scalar_lea.vmem %s765_s16, 128  ;;  %s631_s23 = smov [#allocation8]  }
  0x55   : > { %p571_p3 = scmp.ne.s32.totalorder %s765_s16, %s570_s26  ;;  %s575_s30 = sshll.u32 %s631_s23, 4  ;;  %s576_s30 = int_to_ptr.vmem [resolvable:$false] %s575_s30 }
  0x56   : > { %s577_s29 = scalar_lea.vmem %s576_s30, 256  ;;  %p578_p4 = scmp.lt.s32.totalorder %s765_s16, %s576_s30 }
  0x57   : > { %p573_p5 = pnand %p571_p3, %p728_p10  ;;  %p579_p1 = scmp.lt.s32.totalorder %s577_s29, %s570_s26 }
  0x59   : > { %p574_p6 = pneg %p573_p5  ;;  %p580_p11 = por %p579_p1, %p578_p4 }
  0x5b   : > { %p581_p13 = pnand %p580_p11, %p574_p6 }
  0x5d   : > { %584 = shalt.err (!%p581_p13)
}
  0x5e   : > { %456 = dma.hbm_to_vmem [thread:$0]  (!%p704_p8), %s760_s14, 128, %s765_s16, %s722_s10, %s626_s7, %s626_s7, %s627_s8  }
  0x5f   : > { %p870_p10 = scmp.ne.s32.totalorder %s869_s22, 0 }
  0x60   : > { %s229_s12 = sand.u32 (!%p870_p10), 1, %s615_s18   ;;  %p871_p9 = scmp.ne.s32.totalorder (!%p870_p10), %s866_s25, 0 }
  0x61   : > { %227 = sbr.rel (%p870_p10) target bundleno = 284 (0x11c), region = 36  ;;  %s429_s20 = sshll.u32 (!%p870_p10), %s229_s12, 1 }
  0x62   : > { %s230_s11 = scalar_lea.sflag (!%p870_p10), [#allocation5], %s229_s12  ;;  %s233_s13 = scalar_lea.vmem (!%p870_p10), [#allocation4], %s429_s20 }
  0x68   : > { %602 = dma.done.wait (%p871_p9), %s230_s11, 32  }
  0x69   : > { %604 = vsyncadd (%p871_p9), %s230_s11, 4294967264  ;;  %s238_s27 = sand.u32 1, %s680_s0   ;;  %s430_s15 = sshll.u32 %s229_s12, 3 }
  0x6a   : > { %s239_s17 = scalar_lea.sflag [#allocation7], %s238_s27  ;;  %s242_s10 = scalar_lea.vmem [#allocation6], %s430_s15 }
  0x6b   : > { %606 = dma.done.wait (%p871_p9), %s239_s17, 256  }
  0x6c   : > { %608 = vsyncadd (%p871_p9), %s239_s17, 4294967040  ;;  %s251_s7 = scalar_lea.vmem [#allocation8], %s430_s15  ;;  %p432_p8 = scmp.ne.s32.totalorder %s680_s0, 0 }
  0x6d   : > { %vm288_vm0 = vcmask (!%p432_p8), 125952   ;;  %v632_v0 = vmov (!%p432_p8), 0.0  }
  0x6e   : > { %287 = sbr.rel (%p432_p8) target bundleno = 117 (0x75), region = 52  ;;  %289 = vst.msk [vmem:[#allocation2] sm:$0xf] (!%p432_p8), %vm288_vm0, %v632_v0 }
  0x75 PF: > { %v433_v1 = vld [vmem:[%s233_s13] ss:$0 sm:$0xff]  ;;  %v434_v2 = vld [vmem:[%s233_s13 + $0x1] ss:$0 sm:$0xff]  ;;  %v292_v3 = vld [vmem:[%s242_s10] sm:$0xf] }
  0x76   : > { %v293_v4 = vld [vmem:[%s242_s10 + $0x4] sm:$0xf]  ;;  %v306_v5 = vsub.f32 %v433_v1, %v292_v3  ;;  %v310_v7 = vld [vmem:[%s251_s7] sm:$0xf]  ;;  %v311_v9 = vld [vmem:[%s251_s7 + $0x4] sm:$0xf] }
  0x77   : > { %v307_v6 = vsub.f32 %v434_v2, %v293_v4  ;;  %vm315_vm1 = vcmask 125952   ;;  %v314_v14 = vld [vmem:[#allocation2] sm:$0xf]  ;;  %p435_p0 = scmp.ne.s32.totalorder %s680_s0, 2 }
  0x78   : > { %v308_v8 = vand.u32 2147483647, %v306_v5  ;;  %s329_s25 = sld [smem:[#allocation3]] (!%p435_p0)  ;;  %vm332_vm2 = vcmask (!%p435_p0), 3072  }
  0x79   : > { %v309_v10 = vand.u32 2147483647, %v307_v6 }
  0x7a   : > { %v312_v11 = vmul.f32 %v310_v7, %v308_v8 }
  0x7b   : > { %v313_v12 = vmul.f32 %v311_v9, %v309_v10 }
  0x7c   : > { %v316_v13 = vsel %vm315_vm1, %v312_v11, 0.0  ;;  %324 = sbr.rel (%p435_p0) target bundleno = 284 (0x11c), region = 56 }
  0x7d   : > { %v317_v15 = vsel %vm315_vm1, %v313_v12, 0.0 }
  0x7e   : > { %v318_v16 = vadd.f32 %v317_v15, %v316_v13  ;;  %v330_v20 = vstv (!%p435_p0), %s329_s25 }
  0x80   : > { %v319_v17 = vadd.f32 %v318_v16, %v314_v14 }
  0x82   : > { %320 = vst.msk [vmem:[#allocation2] sm:$0xf] %vm315_vm1, %v319_v17 }
  0x89   : > { %v325_v18 = vld [vmem:[#allocation2] sm:$0xf] }
  0x8a   : > { %v326_v19 = vsel %vm315_vm1, %v325_v18, 0.0 }
  0x8b   : > { %327 = vadd.xlane.f32.xlu0 %v326_v19 }
 0x118   : > { %v328_v21 = vpop.xlane.xlu0 %327 }
 0x119   : > { %v331_v22 = vmul.f32 %v330_v20, %v328_v21 }
 0x11b   : > { %333 = vst.msk [vmem:[%s864_s4] sm:$0xf] %vm332_vm2, %v331_v22 }
 0x11c PF: > { %p18_p7 = scmp.ge.s32.totalorder %s683_s21, 5   ;;  %s872_s17 = smov %s615_s18 }
 0x11d   : > { %s873_s18 = smov %s619_s19  ;;  %s874_s19 = smov %s693_s24 }
 0x11e   : > { %s875_s20 = smov %s683_s21  ;;  %20 = sbr.rel (!%p18_p7) target bundleno = 7 (0x7), region = 104 }
 0x125   :  { %345 = vsyncpa [#allocation5], 1 }
 0x126   :  { %347 = vsyncpa [#allocation5 + $0x1], 1 }
 0x127   :  { %348 = vsyncpa [#allocation7], 1 }
 0x128   :  { %350 = vsyncpa [#allocation7 + $0x1], 1 }

</bundles_post_ra>
